<compile_context>
chip_gen: v7x
topology: tpu7x:2x2x1
jax: 0.10.0
libtpu: 0.0.40
codegen_flags: <defaults>
</compile_context>

<pallas_src>
import jax
import jax.numpy as jnp
from jax.experimental import pallas as pl
from jax.experimental.pallas import tpu as pltpu

_LANES = 128
_MAX_WIDTH = 1024            # lanes per row (multiple of 128)
_MAX_TILE_ROWS = 512         # (512, 1024) f32 = 2 MiB / block
_PALLAS_MIN_ELEMS = 1 << 14  # below this, plain XLA beats the pallas_call fixed cost


def _cdiv(a, b):
    return -(-a // b)


def _round_up(x, m):
    return _cdiv(x, m) * m


def affine_kernel(a_ref, b_ref, x_ref, o_ref):
    # a_ref / b_ref are (1,1) scalars in SMEM; x_ref / o_ref are lane-dense VMEM tiles.
    a = a_ref[0, 0]
    b = b_ref[0, 0]
    o_ref[...] = a * x_ref[...] + b


def _affine_pallas(x, a_s, b_s, *, tile_rows=None):
    """Tiled Pallas path. x: (N,) f32; a_s, b_s: scalar f32."""
    n = x.shape[0]

    # Lane-dense slab: last dim a multiple of 128, capped at 1024.
    width = _MAX_WIDTH if n >= _MAX_WIDTH else _round_up(n, _LANES)
    rows = _cdiv(n, width)

    if tile_rows is None:
        tile_rows = min(rows, _MAX_TILE_ROWS)
    if tile_rows < rows:
        # Keep the sublane dim (8,128)-aligned when actually tiling.
        tile_rows = _round_up(tile_rows, 8)
    if tile_rows >= rows:
        tile_rows = rows  # single full-extent block

    grid_rows = _cdiv(rows, tile_rows)
    rows_padded = grid_rows * tile_rows
    total = rows_padded * width

    a2 = jnp.asarray(a_s, jnp.float32).reshape(1, 1)
    b2 = jnp.asarray(b_s, jnp.float32).reshape(1, 1)

    xf = x.astype(jnp.float32)
    if total != n:
        xf = jnp.pad(xf, (0, total - n))
    x2 = xf.reshape(rows_padded, width)

    out = pl.pallas_call(
        affine_kernel,
        out_shape=jax.ShapeDtypeStruct((rows_padded, width), jnp.float32),
        grid=(grid_rows,),
        in_specs=[
            pl.BlockSpec(memory_space=pltpu.SMEM),                # a (1,1) scalar
            pl.BlockSpec(memory_space=pltpu.SMEM),                # b (1,1) scalar
            pl.BlockSpec((tile_rows, width), lambda i: (i, 0)),   # x tile
        ],
        out_specs=pl.BlockSpec((tile_rows, width), lambda i: (i, 0)),
        input_output_aliases={2: 0},  # donate the padded x slab to the output
        compiler_params=pltpu.CompilerParams(
            dimension_semantics=("parallel",)),
    )(a2, b2, x2)
    return out.reshape(total)[:n]


def net_forward(x, a, b, *, force_pallas=False, tile_rows=None):
    """Pallas equivalent of Net.forward: yhat = a * x + b.

    x: (N,) float32; a, b: (1,)-shaped (or scalar) parameters.
    """
    n = x.shape[0]
    a_s = jnp.asarray(a, jnp.float32).reshape(-1)[0]
    b_s = jnp.asarray(b, jnp.float32).reshape(-1)[0]

    if n < _PALLAS_MIN_ELEMS and not force_pallas:
        # Tiny payload (e.g. the spec's N=100): a pallas_call is pure launch/DMA
        # overhead here, so compute the affine map directly in XLA.
        return a_s * x.astype(jnp.float32) + b_s

    return _affine_pallas(x, a_s, b_s, tile_rows=tile_rows)


if __name__ == "__main__":
    key = jax.random.PRNGKey(0)
    ka, kb = jax.random.split(key)

    # Deterministic parameter init (same shapes as torch.rand(1) parameters).
    a = jax.random.uniform(ka, (1,), dtype=jnp.float32)
    b = jax.random.uniform(kb, (1,), dtype=jnp.float32)

    # Spec input: x = torch.arange(100, dtype=torch.float32) / 100
    x = jnp.arange(100, dtype=jnp.float32) / 100.0
    ref = a[0] * x + b[0]

    # 1) Size-gated path (small N -> plain jnp, per perf review).
    y_gated = jax.block_until_ready(net_forward(x, a, b))
    assert y_gated.shape == (100,)
    assert jnp.allclose(y_gated, ref, atol=1e-6), "gated path mismatch vs reference"

    # 2) Forced Pallas path on the spec input (single lane-dense (1,128) block).
    y_pallas = jax.block_until_ready(net_forward(x, a, b, force_pallas=True))
    assert y_pallas.shape == (100,)
    assert jnp.allclose(y_pallas, ref, atol=1e-6), "pallas path mismatch vs reference"

    # 3) Tiled Pallas path: non-aligned N, (8,1024) blocks, grid of 3 "parallel" steps.
    xb = jax.random.uniform(jax.random.PRNGKey(1), (20 * 1024 + 7,), dtype=jnp.float32)
    refb = a[0] * xb + b[0]
    y_big = jax.block_until_ready(net_forward(xb, a, b, tile_rows=8))
    assert y_big.shape == xb.shape
    assert jnp.allclose(y_big, refb, atol=1e-6), "tiled pallas path mismatch vs reference"

    # 4) Exact-tiling path: N a multiple of (tile_rows * width), no padding copy,
    #    default (512, 1024) blocks, multi-step parallel grid.
    xc = jax.random.uniform(jax.random.PRNGKey(2), (2 * 512 * 1024,), dtype=jnp.float32)
    refc = a[0] * xc + b[0]
    y_exact = jax.block_until_ready(net_forward(xc, a, b))
    assert y_exact.shape == xc.shape
    assert jnp.allclose(y_exact, refc, atol=1e-6), "exact-tiling pallas path mismatch"

    print("KERNEL_OK")
</pallas_src>

<mosaic_0001>
module attributes {stable_mosaic.version = 11 : i64} {
  func.func @affine_kernel(%arg0: i32, %arg1: memref<1x1xf32, #tpu.memory_space<smem>>, %arg2: memref<1x1xf32, #tpu.memory_space<smem>>, %arg3: memref<1x128xf32, #tpu.memory_space<vmem>>, %arg4: memref<1x128xf32, #tpu.memory_space<vmem>>) attributes {dimension_semantics = [#tpu.dimension_semantics<parallel>], iteration_bounds = array<i64: 1>, scalar_prefetch = 0 : i64, scratch_operands = 0 : i64, tpu.core_type = #tpu.core_type<tc>, window_params = [{transform_indices = @transform_0, window_bounds = array<i64: 1, 1>}, {transform_indices = @transform_1, window_bounds = array<i64: 1, 1>}, {transform_indices = @transform_2, window_bounds = array<i64: 1, 128>}, {transform_indices = @transform_3, window_bounds = array<i64: 1, 128>}]} {
    %c0 = arith.constant 0 : index
    %c0_0 = arith.constant 0 : index
    %0 = memref.load %arg1[%c0, %c0_0] : memref<1x1xf32, #tpu.memory_space<smem>>
    %c0_1 = arith.constant 0 : index
    %c0_2 = arith.constant 0 : index
    %1 = memref.load %arg2[%c0_1, %c0_2] : memref<1x1xf32, #tpu.memory_space<smem>>
    %c0_3 = arith.constant 0 : index
    %c0_4 = arith.constant 0 : index
    %2 = vector.load %arg3[%c0_3, %c0_4] : memref<1x128xf32, #tpu.memory_space<vmem>>, vector<1x128xf32>
    %3 = vector.broadcast %0 : f32 to vector<1x128xf32>
    %4 = arith.mulf %3, %2 : vector<1x128xf32>
    %5 = vector.broadcast %1 : f32 to vector<1x128xf32>
    %6 = arith.addf %4, %5 : vector<1x128xf32>
    %c0_5 = arith.constant 0 : index
    %c0_6 = arith.constant 0 : index
    %7 = vector.load %arg4[%c0_5, %c0_6] : memref<1x128xf32, #tpu.memory_space<vmem>>, vector<1x128xf32>
    tpu.vector_store %arg4[%c0_5, %c0_6], %6 {strides = array<i32>} : memref<1x128xf32, #tpu.memory_space<vmem>>, vector<1x128xf32>,
    return
  }
  func.func @transform_0(%arg0: i32) -> (i32, i32) {
    %c0_i32 = arith.constant 0 : i32
    %c0_i32_0 = arith.constant 0 : i32
    %c0_i32_1 = arith.constant 0 : i32
    return %c0_i32, %c0_i32_0 : i32, i32
  }
  func.func @transform_1(%arg0: i32) -> (i32, i32) {
    %c0_i32 = arith.constant 0 : i32
    %c0_i32_0 = arith.constant 0 : i32
    %c0_i32_1 = arith.constant 0 : i32
    return %c0_i32, %c0_i32_0 : i32, i32
  }
  func.func @transform_2(%arg0: i32) -> (i32, i32) {
    %c0_i32 = arith.constant 0 : i32
    %c0_i32_0 = arith.constant 0 : i32
    return %arg0, %c0_i32 : i32, i32
  }
  func.func @transform_3(%arg0: i32) -> (i32, i32) {
    %c0_i32 = arith.constant 0 : i32
    %c0_i32_0 = arith.constant 0 : i32
    return %arg0, %c0_i32 : i32, i32
  }
}

</mosaic_0001>

<bundles_post_ra>
// kernel: tpu_custom_call.1
= control target key start
LH: loop header
LB: loop body
LE: loop exit
PB: predicated region body
PF: predicated region fallthrough
CT: control target
= control target key end

     0   :  { %10 = vsyncpa [#allocation5], 0  ;;  %s154_s0 = inlined_call_operand.<no memory space> [shape: f32[1,1], index: 0, kind: input, shape index: {}]   ;;  %s155_s1 = inlined_call_operand.<no memory space> [shape: f32[1,1], index: 1, kind: input, shape index: {}]   ;;  %s156_s2 = inlined_call_operand.hbm [shape: f32[1,128], index: 2, kind: input, shape index: {}, may-alias: {2,3}]   ;;  %s157_s3 = inlined_call_operand.hbm [shape: f32[1,128], index: 3, kind: output, shape index: {}, may-alias: {2,3}]  }
   0x1   :  { %11 = vsyncpa [#allocation6], 0  ;;  %s102_s12 = smov [#allocation4]   ;;  %s54_s16 = scalar_lea.hbm %s156_s2, 16 }
   0x2   :  { %s22_s13 = sshll.u32 %s102_s12, 4  ;;  %p55_p0 = scmp.ne.s32.totalorder %s156_s2, %s54_s16  ;;  %s23_s13 = int_to_ptr.vmem [resolvable:$true] %s22_s13 }
   0x3   :  { %p58_p1 = scmp.lt.u32.totalorder %s54_s16, %s156_s2 }
   0x5   :  { %p60_p2 = pnand %p58_p1, %p55_p0 }
   0x7   :  { %63 = shalt.err (!%p60_p2)
}
   0x8   :  { %s64_s21 = scalar_lea.vmem %s23_s13, 16  ;;  %s68_s22 = scalar_lea.vmem %s23_s13, 32 }
   0x9   :  { %p65_p3 = scmp.ne.s32.totalorder %s23_s13, %s64_s21  ;;  %p69_p4 = scmp.lt.s32.totalorder %s23_s13, %s23_s13 }
   0xa   :  { %p70_p5 = scmp.lt.s32.totalorder %s68_s22, %s64_s21 }
   0xc   :  { %p71_p6 = por %p70_p5, %p69_p4 }
   0xe   :  { %p72_p7 = pnand %p71_p6, %p65_p3 }
  0x10   :  { %75 = shalt.err (!%p72_p7)
}
  0x11   :  { %25 = dma.hbm_to_vmem [thread:$0]  %s156_s2, 16, %s23_s13, [#allocation5]  }
  0x12   :  { %98 = dma.done.wait [#allocation5], 16  }
  0x13   :  { %99 = vsyncadd [#allocation5], 4294967280  ;;  %v32_v0 = vstv %s154_s0  ;;  %v31_v1 = vld [vmem:[#allocation4] sm:$0x1]  ;;  %v34_v2 = vstv %s155_s1  ;;  %s103_s29 = smov [#allocation7]  }
  0x14   :  { %s43_s30 = sshll.u32 %s103_s29, 4  ;;  %v33_v3 = vmul.f32 %v32_v0, %v31_v1  ;;  %s44_s30 = int_to_ptr.vmem [resolvable:$true] %s43_s30 }
  0x15   :  { %s76_s4 = scalar_lea.vmem %s44_s30, 16  ;;  %s80_s2 = scalar_lea.vmem %s44_s30, 32 }
  0x16   :  { %v35_v4 = vadd.f32 %v34_v2, %v33_v3  ;;  %p77_p8 = scmp.ne.s32.totalorder %s44_s30, %s76_s4  ;;  %p81_p9 = scmp.lt.s32.totalorder %s44_s30, %s44_s30 }
  0x17   :  { %p82_p10 = scmp.lt.s32.totalorder %s80_s2, %s76_s4 }
  0x18   :  { %36 = vst [vmem:[#allocation7] sm:$0x1] %v35_v4 }
  0x19   :  { %p83_p11 = por %p82_p10, %p81_p9 }
  0x1b   :  { %p84_p12 = pnand %p83_p11, %p77_p8 }
  0x1d   :  { %87 = shalt.err (!%p84_p12)
}
  0x1e   :  { %s88_s6 = scalar_lea.hbm %s157_s3, 16 }
  0x1f   :  { %p89_p13 = scmp.ne.s32.totalorder %s157_s3, %s88_s6  ;;  %p92_p0 = scmp.lt.u32.totalorder %s88_s6, %s157_s3 }
  0x21   :  { %p94_p1 = pnand %p92_p0, %p89_p13 }
  0x23   :  { %97 = shalt.err (!%p94_p1)
}
  0x24   :  { %46 = dma.vmem_to_hbm [thread:$0]  %s44_s30, 16, %s157_s3, [#allocation6]  }
  0x25   :  { %100 = dma.done.wait [#allocation6], 16  }
  0x26   :  { %101 = vsyncadd [#allocation6], 4294967280 }
  0x27   :  { %50 = vsyncpa [#allocation5], 1 }
  0x28   :  { %51 = vsyncpa [#allocation6], 1 }

</bundles_post_ra>
